<compile_context>
chip_gen: v5e
topology: v5e:2x2
jax: 0.10.0
libtpu: 0.0.40
codegen_flags: <defaults>
</compile_context>

<pallas_src>
import functools

import jax
import jax.numpy as jnp
from jax.experimental import pallas as pl
from jax.experimental.pallas import tpu as pltpu


def _round_up(x, m):
    return ((x + m - 1) // m) * m


def _vmem_capacity_bytes():
    """Per-core VMEM capacity; conservative (v7x) fallback if unavailable."""
    try:
        cap = int(pltpu.get_tpu_info().vmem_capacity_bytes)
        if cap > 0:
            return cap
    except Exception:
        pass
    return 64 * 1024 * 1024


def _vmem_budgets():
    cap = _vmem_capacity_bytes()
    # Request well above the 16/32 MiB scoped default but leave headroom for
    # compiler-internal scratch: 128 MiB parts (v5e/v6e) -> 96 MiB limit,
    # 64 MiB-per-core v7x -> 48 MiB.
    limit = max(min(int(cap * 0.75), cap - (8 << 20)), 32 << 20)
    tile_budget = max(limit - (8 << 20), 24 << 20)
    return tile_budget, limit


def _vmem_estimate(tm, tk, n_pad, f_pad, adj_isz, x_isz, out_isz, x_resident):
    adj = 2 * 2 * tm * tk * adj_isz                    # 2 adjacencies, double-buffered
    xb = 2 * (n_pad * f_pad if x_resident else tk * f_pad) * x_isz
    ob = 2 * tm * 2 * f_pad * out_isz                  # k-resident output block
    acc = tm * 2 * f_pad * 4                           # f32 scratch accumulator
    # In-kernel temporaries: bf16 copies of both adjacency tiles, bf16 x tile,
    # and the two f32 dot results.
    tmp = 2 * tm * tk * 2 + tk * f_pad * 2 + 2 * tm * f_pad * 4
    return adj + xb + ob + acc + tmp


def _select_tiles(n_pad, f_pad, adj_isz, x_isz, out_isz, budget):
    """Pick (tm, tk, x_resident).  tm/tk divide n_pad and are multiples of 128.

    Preference order (per perf review): keep tk large (DMA row length / MXU K
    depth) and shrink tm first; try to keep x VMEM-resident.
    """
    m = n_pad // 128
    divs = sorted({128 * d for d in range(1, m + 1) if m % d == 0}, reverse=True)
    tk_cands = [t for t in divs if t <= 2048] or [128]
    # Aim for >= 4 row tiles when N allows so the parallel axis load-balances
    # v7x's two TensorCores.
    tm_cap = min(512, max(128, n_pad // 4))
    tm_cands = [t for t in divs if t <= tm_cap] or [128]
    for x_resident in (True, False):
        for tk in tk_cands:            # largest tk first
            for tm in tm_cands:        # shrink tm before giving up on tk
                if _vmem_estimate(tm, tk, n_pad, f_pad, adj_isz, x_isz,
                                  out_isz, x_resident) <= budget:
                    return tm, tk, x_resident
    return tm_cands[-1], tk_cands[-1], False


def h2gcn_kernel(adj1_ref, adj2_ref, x_ref, o_ref, acc_ref, *, x_resident):
    """Grid = (n_pad//tm, n_pad//tk).  Axis 0 tiles output rows ("parallel"),
    axis 1 reduces over the neighbor dimension ("arbitrary").  Partial sums
    accumulate in a f32 VMEM scratch; the output block is written once, at the
    last k step (so the output dtype may be narrower than f32)."""
    k = pl.program_id(1)
    tk = adj1_ref.shape[1]
    feat = x_ref.shape[1]

    @pl.when(k == 0)
    def _():
        acc_ref[...] = jnp.zeros_like(acc_ref)

    if x_resident:
        # x is the full resident [n_pad, f_pad] array; slice the k-th row band.
        start = pl.multiple_of(k * tk, tk)
        x_tile = x_ref[pl.ds(start, tk), :]
    else:
        x_tile = x_ref[...]

    a1 = adj1_ref[...]
    a2 = adj2_ref[...]

    # Fast path: int8/bf16 adjacency (exact for 0/1 graphs) -> bf16 MXU dots
    # with f32 accumulation.  An f32 adjacency keeps an exact f32 matmul so
    # weighted/normalized graphs match the PyTorch reference.
    compute_dtype = jnp.float32 if a1.dtype == jnp.float32 else jnp.bfloat16
    a1 = a1.astype(compute_dtype)
    a2 = a2.astype(compute_dtype)
    xt = x_tile.astype(compute_dtype)

    # Concatenation along dim=1: first F cols <- adj_t @ x, second <- adj_t2 @ x.
    acc_ref[:, :feat] += jnp.dot(a1, xt, preferred_element_type=jnp.float32)
    acc_ref[:, feat:] += jnp.dot(a2, xt, preferred_element_type=jnp.float32)

    @pl.when(k == pl.num_programs(1) - 1)
    def _():
        o_ref[...] = acc_ref[...].astype(o_ref.dtype)


def h2gcn_conv(x, adj_t, adj_t2):
    N, F = x.shape
    assert adj_t.shape == (N, N) and adj_t2.shape == (N, N)

    # Pad N and F up to multiples of 128: legal blocks for any input size and
    # lane-dense output stores.  Zero padding is semantically inert (padded
    # adjacency rows/cols and padded x rows are zero).
    n_pad = _round_up(N, 128)
    f_pad = _round_up(F, 128)
    if n_pad != N or f_pad != F:
        x = jnp.pad(x, ((0, n_pad - N), (0, f_pad - F)))
        adj_t = jnp.pad(adj_t, ((0, n_pad - N), (0, n_pad - N)))
        adj_t2 = jnp.pad(adj_t2, ((0, n_pad - N), (0, n_pad - N)))

    adj_isz = jnp.dtype(adj_t.dtype).itemsize
    x_isz = jnp.dtype(x.dtype).itemsize
    out_dtype = x.dtype
    out_isz = jnp.dtype(out_dtype).itemsize

    tile_budget, vmem_limit = _vmem_budgets()
    tm, tk, x_resident = _select_tiles(n_pad, f_pad, adj_isz, x_isz, out_isz,
                                       tile_budget)
    grid = (n_pad // tm, n_pad // tk)

    if x_resident:
        # DMA x into VMEM once; it stays resident across the whole grid.
        x_spec = pl.BlockSpec((n_pad, f_pad), lambda i, k: (0, 0))
    else:
        x_spec = pl.BlockSpec((tk, f_pad), lambda i, k: (k, 0))

    out_pad = pl.pallas_call(
        functools.partial(h2gcn_kernel, x_resident=x_resident),
        out_shape=jax.ShapeDtypeStruct((n_pad, 2 * f_pad), out_dtype),
        grid_spec=pltpu.PrefetchScalarGridSpec(
            num_scalar_prefetch=0,
            grid=grid,
            in_specs=[
                pl.BlockSpec((tm, tk), lambda i, k: (i, k)),   # adj_t tile
                pl.BlockSpec((tm, tk), lambda i, k: (i, k)),   # adj_t2 tile
                x_spec,                                        # x (resident or per-k)
            ],
            out_specs=pl.BlockSpec((tm, 2 * f_pad), lambda i, k: (i, 0)),
            scratch_shapes=[pltpu.VMEM((tm, 2 * f_pad), jnp.float32)],
        ),
        compiler_params=pltpu.CompilerParams(
            dimension_semantics=("parallel", "arbitrary"),
            vmem_limit_bytes=vmem_limit),
    )(adj_t, adj_t2, x)

    if n_pad == N and f_pad == F:
        return out_pad
    # Undo the padding: keep the first F columns of each concatenated half.
    return jnp.concatenate(
        [out_pad[:N, :F], out_pad[:N, f_pad:f_pad + F]], axis=1)


if __name__ == "__main__":
    key = jax.random.PRNGKey(0)
    k_x, k_a1, k_a2, k_x2, k_a3, k_a4 = jax.random.split(key, 6)

    # --- aligned case: N=256 nodes, F=128 features ---
    N, F = 256, 128
    x = jax.random.normal(k_x, (N, F), dtype=jnp.float32)
    # Synthetic ~5%-dense 0/1 adjacencies materialized dense (matching
    # adj_t.to_dense()); stored as int8 so the dominant HBM stream is 1 B/elem.
    mask1 = jax.random.uniform(k_a1, (N, N)) < 0.05
    mask2 = jax.random.uniform(k_a2, (N, N)) < 0.05
    adj_t = mask1.astype(jnp.int8)
    adj_t2 = mask2.astype(jnp.int8)

    out = jax.block_until_ready(h2gcn_conv(x, adj_t, adj_t2))
    ref = jnp.concatenate([mask1.astype(jnp.float32) @ x,
                           mask2.astype(jnp.float32) @ x], axis=1)
    assert out.shape == (N, 2 * F)
    # bf16 x tiles in the MXU (f32 accumulation) -> tolerance vs exact f32 ref.
    assert jnp.allclose(out, ref, atol=1e-1, rtol=2e-2), \
        float(jnp.max(jnp.abs(out - ref)))

    # --- awkward shapes: exercises the N/F padding path ---
    N2, F2 = 250, 96
    x2 = jax.random.normal(k_x2, (N2, F2), dtype=jnp.float32)
    m3 = jax.random.uniform(k_a3, (N2, N2)) < 0.05
    m4 = jax.random.uniform(k_a4, (N2, N2)) < 0.05
    out2 = jax.block_until_ready(
        h2gcn_conv(x2, m3.astype(jnp.int8), m4.astype(jnp.int8)))
    ref2 = jnp.concatenate([m3.astype(jnp.float32) @ x2,
                            m4.astype(jnp.float32) @ x2], axis=1)
    assert out2.shape == (N2, 2 * F2)
    assert jnp.allclose(out2, ref2, atol=1e-1, rtol=2e-2), \
        float(jnp.max(jnp.abs(out2 - ref2)))

    print("KERNEL_OK")
</pallas_src>

<mosaic_0001>
module attributes {stable_mosaic.version = 11 : i64} {
  func.func @h2gcn_kernel(%arg0: i32, %arg1: i32, %arg2: memref<128x256xi8, #tpu.memory_space<vmem>>, %arg3: memref<128x256xi8, #tpu.memory_space<vmem>>, %arg4: memref<256x128xf32, #tpu.memory_space<vmem>>, %arg5: memref<128x256xf32, #tpu.memory_space<vmem>>, %arg6: memref<128x256xf32, #tpu.memory_space<vmem>>) attributes {dimension_semantics = [#tpu.dimension_semantics<parallel>, #tpu.dimension_semantics<arbitrary>], iteration_bounds = array<i64: 2, 1>, scalar_prefetch = 0 : i64, scratch_operands = 1 : i64, tpu.core_type = #tpu.core_type<tc>, window_params = [{transform_indices = @transform_0, window_bounds = array<i64: 128, 256>}, {transform_indices = @transform_1, window_bounds = array<i64: 128, 256>}, {pipeline_mode = #tpu.pipeline_mode<synchronous>, transform_indices = @transform_2, window_bounds = array<i64: 256, 128>}, {transform_indices = @transform_3, window_bounds = array<i64: 128, 256>}]} {
    %c0_i32 = arith.constant 0 : i32
    %0 = arith.cmpi eq, %arg1, %c0_i32 : i32
    %1 = arith.extui %0 : i1 to i32
    %c0_i32_0 = arith.constant 0 : i32
    %2 = arith.cmpi ne, %1, %c0_i32_0 : i32
    scf.if %2 {
      %cst_15 = arith.constant 0.000000e+00 : f32
      %23 = vector.broadcast %cst_15 : f32 to vector<128x256xf32>
      %c0_16 = arith.constant 0 : index
      %c0_17 = arith.constant 0 : index
      %24 = vector.load %arg6[%c0_16, %c0_17] : memref<128x256xf32, #tpu.memory_space<vmem>>, vector<128x256xf32>
      tpu.vector_store %arg6[%c0_16, %c0_17], %23 {strides = array<i32>} : memref<128x256xf32, #tpu.memory_space<vmem>>, vector<128x256xf32>,
    } else {
    }
    %c256_i32 = arith.constant 256 : i32
    %3 = arith.muli %arg1, %c256_i32 : i32
    %4 = tpu.assume_multiple %3, 256 : i32
    %5 = arith.index_cast %4 : i32 to index
    %c0 = arith.constant 0 : index
    %6 = vector.load %arg4[%5, %c0] : memref<256x128xf32, #tpu.memory_space<vmem>>, vector<256x128xf32>
    %c0_1 = arith.constant 0 : index
    %c0_2 = arith.constant 0 : index
    %7 = vector.load %arg2[%c0_1, %c0_2] : memref<128x256xi8, #tpu.memory_space<vmem>>, vector<128x256xi8>
    %c0_3 = arith.constant 0 : index
    %c0_4 = arith.constant 0 : index
    %8 = vector.load %arg3[%c0_3, %c0_4] : memref<128x256xi8, #tpu.memory_space<vmem>>, vector<128x256xi8>
    %9 = arith.sitofp %7 : vector<128x256xi8> to vector<128x256xbf16>
    %10 = arith.sitofp %8 : vector<128x256xi8> to vector<128x256xbf16>
    %11 = arith.truncf %6 : vector<256x128xf32> to vector<256x128xbf16>
    %c0_5 = arith.constant 0 : index
    %c0_6 = arith.constant 0 : index
    %12 = vector.load %arg6[%c0_5, %c0_6] : memref<128x256xf32, #tpu.memory_space<vmem>>, vector<128x128xf32>
    %cst = arith.constant dense<0.000000e+00> : vector<128x128xf32>
    %13 = tpu.matmul %9, %11, %cst {dimension_numbers = #tpu.dot_dimension_numbers<[1], [0], [0], [1], [0, 0, 1, 1], [], []>} : vector<128x256xbf16>, vector<256x128xbf16>, vector<128x128xf32> -> vector<128x128xf32>
    %14 = arith.addf %12, %13 : vector<128x128xf32>
    %c0_7 = arith.constant 0 : index
    %c0_8 = arith.constant 0 : index
    %15 = vector.load %arg6[%c0_7, %c0_8] : memref<128x256xf32, #tpu.memory_space<vmem>>, vector<128x128xf32>
    tpu.vector_store %arg6[%c0_7, %c0_8], %14 {strides = array<i32>} : memref<128x256xf32, #tpu.memory_space<vmem>>, vector<128x128xf32>,
    %c0_9 = arith.constant 0 : index
    %c128 = arith.constant 128 : index
    %16 = vector.load %arg6[%c0_9, %c128] : memref<128x256xf32, #tpu.memory_space<vmem>>, vector<128x128xf32>
    %cst_10 = arith.constant dense<0.000000e+00> : vector<128x128xf32>
    %17 = tpu.matmul %10, %11, %cst_10 {dimension_numbers = #tpu.dot_dimension_numbers<[1], [0], [0], [1], [0, 0, 1, 1], [], []>} : vector<128x256xbf16>, vector<256x128xbf16>, vector<128x128xf32> -> vector<128x128xf32>
    %18 = arith.addf %16, %17 : vector<128x128xf32>
    %c0_11 = arith.constant 0 : index
    %c128_12 = arith.constant 128 : index
    %19 = vector.load %arg6[%c0_11, %c128_12] : memref<128x256xf32, #tpu.memory_space<vmem>>, vector<128x128xf32>
    tpu.vector_store %arg6[%c0_11, %c128_12], %18 {strides = array<i32>} : memref<128x256xf32, #tpu.memory_space<vmem>>, vector<128x128xf32>,
    %c0_i32_13 = arith.constant 0 : i32
    %20 = arith.cmpi eq, %arg1, %c0_i32_13 : i32
    %21 = arith.extui %20 : i1 to i32
    %c0_i32_14 = arith.constant 0 : i32
    %22 = arith.cmpi ne, %21, %c0_i32_14 : i32
    scf.if %22 {
      %c0_15 = arith.constant 0 : index
      %c0_16 = arith.constant 0 : index
      %23 = vector.load %arg6[%c0_15, %c0_16] : memref<128x256xf32, #tpu.memory_space<vmem>>, vector<128x256xf32>
      %c0_17 = arith.constant 0 : index
      %c0_18 = arith.constant 0 : index
      %24 = vector.load %arg5[%c0_17, %c0_18] : memref<128x256xf32, #tpu.memory_space<vmem>>, vector<128x256xf32>
      tpu.vector_store %arg5[%c0_17, %c0_18], %23 {strides = array<i32>} : memref<128x256xf32, #tpu.memory_space<vmem>>, vector<128x256xf32>,
    } else {
    }
    return
  }
  func.func @transform_0(%arg0: i32, %arg1: i32) -> (i32, i32) {
    %c0_i32 = arith.constant 0 : i32
    return %arg0, %arg1 : i32, i32
  }
  func.func @transform_1(%arg0: i32, %arg1: i32) -> (i32, i32) {
    %c0_i32 = arith.constant 0 : i32
    return %arg0, %arg1 : i32, i32
  }
  func.func @transform_2(%arg0: i32, %arg1: i32) -> (i32, i32) {
    %c0_i32 = arith.constant 0 : i32
    %c0_i32_0 = arith.constant 0 : i32
    %c0_i32_1 = arith.constant 0 : i32
    return %c0_i32, %c0_i32_0 : i32, i32
  }
  func.func @transform_3(%arg0: i32, %arg1: i32) -> (i32, i32) {
    %c0_i32 = arith.constant 0 : i32
    %c0_i32_0 = arith.constant 0 : i32
    return %arg0, %c0_i32 : i32, i32
  }
}

</mosaic_0001>

<bundles_post_ra>
// kernel: tpu_custom_call.1
= control target key start
LH: loop header
LB: loop body
LE: loop exit
PB: predicated region body
PF: predicated region fallthrough
CT: control target
= control target key end

     0   :  { %s1574_s0 = inlined_call_operand.hbm [shape: s8[256,256], index: 0, kind: input, shape index: {}]   ;;  %s1575_s1 = inlined_call_operand.hbm [shape: s8[256,256], index: 1, kind: input, shape index: {}]   ;;  %s1576_s2 = inlined_call_operand.hbm [shape: f32[256,128], index: 2, kind: input, shape index: {}]   ;;  %s1577_s3 = inlined_call_operand.hbm [shape: f32[256,256], index: 3, kind: output, shape index: {}]  }
   0x1   :  { %1580 = sst [smem:[#allocation17_spill]] %s1576_s2 }
   0x2   :  { %8 = vsyncpa [#allocation4], 0 }
   0x3   :  { %10 = vsyncpa [#allocation4 + $0x1], 0 }
   0x4   :  { %11 = vsyncpa [#allocation7], 0 }
   0x5   :  { %13 = vsyncpa [#allocation7 + $0x1], 0 }
   0x6   :  { %14 = vsyncpa [#allocation5], 0 }
   0x7   :  { %16 = vsyncpa [#allocation5 + $0x1], 0  ;;  %s1358_s12 = smov 0   ;;  %s1360_s13 = smov 0  }
   0x8   :  { %s1362_s14 = smov 0   ;;  %s1364_s15 = smov 0  }
   0x9   :  { %s1366_s16 = smov 0   ;;  %s1368_s17 = smov 0  }
   0xa LB: > { %1581 = sst [smem:[#allocation14_spill]] %s1325_s16  ;;  %s1389_s18 = sadd.s32 4294967295, %s1329_s17   ;;  %s1329_s17 = sphi %s1368_s17, %s22_s17   ;;  %s1325_s16 = sphi %s1366_s16, %s1592_s16   ;;  %s1321_s15 = sphi %s1364_s15, %s1591_s15   ;;  %s1317_s14 = sphi %s1362_s14, %s1595_s14   ;;  %s1313_s13 = sphi %s1360_s13, %s1594_s13   ;;  %s1309_s12 = sphi %s1358_s12, %s1593_s12  }
   0xb   : > { %s1036_s19 = sadd.s32 4294967294, %s1329_s17   ;;  %p56_p0 = scmp.ne.s32.totalorder %s1313_s13, %s1309_s12 }
   0xc   : > { %p57_p1 = scmp.eq.s32.totalorder %s1389_s18, 0  ;;  %p129_p2 = scmp.eq.s32.totalorder %s1389_s18, 1 }
   0xd   : > { %p135_p3 = scmp.eq.s32.totalorder %s1036_s19, 1  ;;  %p1037_p5 = scmp.ge.s32.totalorder %s1329_s17, 1 }
   0xe   : > { %p1398_p4 = por %p57_p1, %p56_p0  ;;  %p142_p7 = scmp.lt.s32.totalorder %s1329_s17, 3 }
   0xf   : > { %p1403_p6 = por %p135_p3, %p56_p0  ;;  %s1584_s2 = sld [smem:[#allocation17_spill]] }
  0x10   : > { %p1411_p8 = pnand %p1037_p5, %p142_p7  ;;  %s1331_s26 = smov [#allocation8]  }
  0x11   : > { %s155_s27 = sshll.u32 %s1331_s26, 4  ;;  %p1039_p11 = scmp.ge.s32.totalorder %s1329_s17, 2  ;;  %s156_s27 = int_to_ptr.vmem [resolvable:$true] %s155_s27 }
  0x12   : > { %p1075_p9 = pneg %p1411_p8  ;;  %s1332_s28 = smov 128  }
  0x13   : > { %s1333_s29 = smov 8   ;;  %s34_s30 = sadd.s32 1, %s1325_s16 }
  0x14   : > { %p1076_p10 = pnand %p1075_p9, %p57_p1  ;;  %p36_p12 = scmp.ge.s32.totalorder %s34_s30, 2 }
  0x15   : > { %s153_s24 = sshll.u32 %s1584_s2, 4  ;;  %s43_s4 = sadd.s32 1, %s1317_s14  ;;  %s154_s24 = int_to_ptr.hbm [resolvable:$true] %s153_s24 }
  0x16   : > { %1078 = dma.hbm_to_vmem [thread:$0]  (!%p1076_p10), %s154_s24, 4096, %s156_s27, [#allocation7], %s1332_s28, %s1332_s28, %s1333_s29  }
  0x17   : > { %p50_p13 = scmp.ne.s32.totalorder %s1317_s14, %s1313_s13  ;;  %p51_p0 = scmp.eq.s32.totalorder %s1329_s17, 0 }
  0x18   : > { %s1597_s30 = smov (%p36_p12, %s34_s30), 0  ;;  %p1091_p7 = scmp.lt.s32.totalorder %s1329_s17, 2 }
  0x19   : > { %1586 = sst [smem:[#allocation15_spill]] %s1597_s30  ;;  %p1427_p3 = por %p51_p0, %p50_p13 }
  0x1a   : > { %p1433_p5 = por %p129_p2, %p50_p13  ;;  %s38_s7 = ssub.s32 %s1325_s16, %s1597_s30 }
  0x1b   : > { %p41_p9 = scmp.eq.s32.totalorder %s38_s7, 0  ;;  %s169_s8 = sand.u32 1, %s1317_s14  }
  0x1c   : > { %s1040_s9 = sshll.u32 %s169_s8, 6  ;;  %s1060_s11 = sshll.u32 %s1325_s16, 6 }
  0x1d   : > { %s1442_s10 = scalar_select %p41_p9, %s1317_s14, %s43_s4  }
  0x1e   : > { %s181_s23 = scalar_lea.hbm %s1574_s0, %s1060_s11  ;;  %s173_s24 = scalar_lea.vmem [#allocation3], %s1040_s9 }
  0x1f   : > { %1589 = sst [smem:[#allocation16_spill]] %s1442_s10  ;;  %s184_s26 = sshll.u32 %s173_s24, 4  ;;  %s185_s26 = int_to_ptr.vmem [resolvable:$true] %s184_s26 }
  0x20   : > { %s182_s27 = sshll.u32 %s181_s23, 4  ;;  %p1080_p2 = pnand %p1091_p7, %p1427_p3  ;;  %s183_s27 = int_to_ptr.hbm [resolvable:$true] %s182_s27 }
  0x21   : > { %s170_s28 = scalar_lea.sflag [#allocation4], %s169_s8  ;;  %s1334_s29 = smov 256  }
  0x22   : > { %s1335_s7 = smov 16   ;;  %s206_s30 = scalar_lea.hbm %s1575_s1, %s1060_s11 }
  0x23   : > { %1082 = dma.hbm_to_vmem [thread:$0]  (!%p1080_p2), %s183_s27, 1024, %s185_s26, %s170_s28, %s1334_s29, %s1334_s29, %s1335_s7  }
  0x24   : > { %s198_s16 = scalar_lea.vmem [#allocation6], %s1040_s9  ;;  %s207_s19 = sshll.u32 %s206_s30, 4  ;;  %s208_s19 = int_to_ptr.hbm [resolvable:$true] %s207_s19 }
  0x25   : > { %s209_s10 = sshll.u32 %s198_s16, 4  ;;  %s194_s22 = sand.u32 1, %s1329_s17   ;;  %s210_s10 = int_to_ptr.vmem [resolvable:$true] %s209_s10 }
  0x26   : > { %s195_s24 = scalar_lea.sflag [#allocation7], %s194_s22  ;;  %221 = sbr.rel (%p1411_p8) target bundleno = 342 (0x156), region = 32 }
  0x27   : > { %1085 = dma.hbm_to_vmem [thread:$0]  (!%p1080_p2), %s208_s19, 1024, %s210_s10, %s195_s24, %s1334_s29, %s1334_s29, %s1335_s7  }
  0x28   : > { %s1457_s5 = sand.u32 (!%p1411_p8), 1, %s1313_s13  }
  0x29   : > { %s1049_s8 = sshll.u32 (!%p1411_p8), %s1457_s5, 6  ;;  %s224_s2 = scalar_lea.sflag (!%p1411_p8), [#allocation4], %s1457_s5 }
  0x2a   : > { %s1461_s11 = scalar_lea.vmem (!%p1411_p8), [#allocation3], %s1049_s8 }
  0x2b   : > { %1292 = dma.done.wait (%p1398_p4), %s224_s2, 1024  }
  0x2c   : > { %1294 = vsyncadd (%p1398_p4), %s224_s2, 4294966272  ;;  %s233_s16 = sand.u32 1, %s1389_s18   ;;  %s1468_s30 = scalar_lea.vmem [#allocation6], %s1049_s8 }
  0x2d   : > { %s234_s25 = scalar_lea.sflag [#allocation7], %s233_s16 }
  0x2e   : > { %1296 = dma.done.wait (%p1398_p4), %s234_s25, 1024  }
  0x2f   : > { %1298 = vsyncadd (%p1398_p4), %s234_s25, 4294966272 }
  0x30   : > { %1300 = dma.done.wait (%p57_p1), [#allocation7], 4096  }
  0x31   : > { %1302 = vsyncadd (%p57_p1), [#allocation7], 4294963200  ;;  %v328_v0 = vld [vmem:[#allocation8 + $0x70] sm:$0xff]  ;;  %v329_v1 = vld [vmem:[#allocation8 + $0x78] sm:$0xff]  ;;  %s1052_s18 = sshll.u32 %s1457_s5, 8  ;;  %s1064_s9 = sshll.u32 %s1321_s15, 8 }
  0x32   : > { %v344_v2 = vld [vmem:[#allocation8 + $0xf0] sm:$0xff]  ;;  %v529_v3 = vpack.c.bf16 %v329_v1, %v328_v0  ;;  %v345_v4 = vld [vmem:[#allocation8 + $0xf8] sm:$0xff]  ;;  %v326_v5 = vld [vmem:[#allocation8 + $0x60] sm:$0xff]  ;;  %s1501_s20 = scalar_lea.vmem [#allocation9], %s1052_s18  ;;  %s910_s26 = scalar_lea.hbm %s1577_s3, %s1064_s9 }
  0x33   : > { %v327_v6 = vld [vmem:[#allocation8 + $0x68] sm:$0xff]  ;;  %v537_v7 = vpack.c.bf16 %v345_v4, %v344_v2  ;;  %v342_v8 = vld [vmem:[#allocation8 + $0xe0] sm:$0xff]  ;;  %v324_v12 = vld [vmem:[#allocation8 + $0x50] sm:$0xff]  ;;  %s911_s27 = sshll.u32 %s1501_s20, 4  ;;  %s913_s28 = sshll.u32 %s910_s26, 4  ;;  %s912_s27 = int_to_ptr.vmem [resolvable:$true] %s911_s27  ;;  %s914_s28 = int_to_ptr.hbm [resolvable:$true] %s913_s28 }
  0x34   : > { %v343_v9 = vld [vmem:[#allocation8 + $0xe8] sm:$0xff]  ;;  %554 = vmatpush.bf16.msra.mxu0 %v529_v3  ;;  %700 = vmatpush.bf16.msra.mxu2 %v529_v3  ;;  %v528_v10 = vpack.c.bf16 %v327_v6, %v326_v5  ;;  %v325_v13 = vld [vmem:[#allocation8 + $0x58] sm:$0xff]  ;;  %v340_v14 = vld [vmem:[#allocation8 + $0xd0] sm:$0xff]  ;;  %s898_s15 = scalar_lea.sflag [#allocation5], %s1457_s5  ;;  %s1253_s29 = sshra.s32 %s914_s28, 4  ;;  %s1254_s29 = int_to_ptr.hbm [resolvable:$true] %s1253_s29 }
  0x35   : > { %603 = vmatpush.bf16.msra.mxu1 %v537_v7  ;;  %749 = vmatpush.bf16.msra.mxu3 %v537_v7  ;;  %v536_v11 = vpack.c.bf16 %v343_v9, %v342_v8  ;;  %v341_v15 = vld [vmem:[#allocation8 + $0xd8] sm:$0xff]  ;;  %v527_v16 = vpack.c.bf16 %v325_v13, %v324_v12  ;;  %v322_v18 = vld [vmem:[#allocation8 + $0x40] sm:$0xff]  ;;  %v323_v19 = vld [vmem:[#allocation8 + $0x48] sm:$0xff]  ;;  %s1255_s7 = scalar_lea.hbm %s1254_s29, 256  ;;  %s1259_s22 = scalar_lea.hbm %s1577_s3, 512 }
  0x36   : > { %v535_v17 = vpack.c.bf16 %v341_v15, %v340_v14  ;;  %v338_v20 = vld [vmem:[#allocation8 + $0xc0] sm:$0xff]  ;;  %v339_v21 = vld [vmem:[#allocation8 + $0xc8] sm:$0xff]  ;;  %v526_v22 = vpack.c.bf16 %v323_v19, %v322_v18  ;;  %v320_v24 = vld [vmem:[#allocation8 + $0x30] sm:$0xff]  ;;  %p1256_p1 = scmp.ne.s32.totalorder %s1254_s29, %s1255_s7  ;;  %p1260_p10 = scmp.lt.s32.totalorder %s1254_s29, %s1577_s3 }
  0x37   : > { %v534_v23 = vpack.c.bf16 %v339_v21, %v338_v20  ;;  %v321_v25 = vld [vmem:[#allocation8 + $0x38] sm:$0xff]  ;;  %v336_v26 = vld [vmem:[#allocation8 + $0xb0] sm:$0xff]  ;;  %v318_v30 = vld [vmem:[#allocation8 + $0x20] sm:$0xff]  ;;  %p1261_p12 = scmp.lt.s32.totalorder %s1259_s22, %s1255_s7 }
  0x38   : > { %555 = vmatpush.bf16.msra.mxu0 %v528_v10  ;;  %701 = vmatpush.bf16.msra.mxu2 %v528_v10  ;;  %v337_v27 = vld [vmem:[#allocation8 + $0xb8] sm:$0xff]  ;;  %v525_v28 = vpack.c.bf16 %v321_v25, %v320_v24  ;;  %v319_v31 = vld [vmem:[#allocation8 + $0x28] sm:$0xff]  ;;  %v334_v32 = vld [vmem:[#allocation8 + $0xa0] sm:$0xff]  ;;  %p1257_p4 = pnand %p1256_p1, %p1433_p5 }
  0x39   : > { %604 = vmatpush.bf16.msra.mxu1 %v536_v11  ;;  %750 = vmatpush.bf16.msra.mxu3 %v536_v11  ;;  %v533_v29 = vpack.c.bf16 %v337_v27, %v336_v26  ;;  %v335_v33 = vld [vmem:[#allocation8 + $0xa8] sm:$0xff]  ;;  %v316_v34 = vld [vmem:[#allocation8 + $0x10] sm:$0xff]  ;;  %v317_v35 = vld [vmem:[#allocation8 + $0x18] sm:$0xff]  ;;  %v524_v36 = vpack.c.bf16 %v319_v31, %v318_v30  ;;  %p1262_p13 = por %p1261_p12, %p1260_p10 }
  0x3a   : > { %v346_v37 = vld [vmem:[%s1461_s11] sm:$0xff]  ;;  %v532_v39 = vpack.c.bf16 %v335_v33, %v334_v32  ;;  %v347_v40 = vld [vmem:[%s1461_s11 + $0x8] sm:$0xff]  ;;  %v523_v42 = vpack.c.bf16 %v317_v35, %v316_v34  ;;  %v332_v43 = vld [vmem:[#allocation8 + $0x90] sm:$0xff]  ;;  %p1258_p8 = pneg %p1257_p4 }
  0x3b   : > { %v1480_v38 = vld [vmem:[%s1468_s30] sm:$0xff]  ;;  %v355_v41 = vld [vmem:[%s1468_s30 + $0x8] sm:$0xff]  ;;  %v333_v44 = vld [vmem:[#allocation8 + $0x98] sm:$0xff]  ;;  %v362_v47 = vunpack.c.0.s8 %v346_v37  ;;  %v364_v48 = vunpack.c.1.s8 %v346_v37  ;;  %v363_v51 = vunpack.c.0.s8 %v347_v40  ;;  %v365_v52 = vunpack.c.1.s8 %v347_v40 }
  0x3c   : > { %556 = vmatpush.bf16.msra.mxu0 %v527_v16  ;;  %702 = vmatpush.bf16.msra.mxu2 %v527_v16  ;;  %v314_v45 = vld [vmem:[#allocation8] sm:$0xff]  ;;  %v315_v46 = vld [vmem:[#allocation8 + $0x8] sm:$0xff]  ;;  %v442_v49 = vunpack.c.0.s8 %v1480_v38  ;;  %v444_v50 = vunpack.c.1.s8 %v1480_v38  ;;  %v443_v53 = vunpack.c.0.s8 %v355_v41  ;;  %v445_v54 = vunpack.c.1.s8 %v355_v41  ;;  %v349_v30 = vld [vmem:[%s1461_s11 + $0x18] sm:$0xff]  ;;  %p1263_p0 = pnand %p1262_p13, %p1258_p8 }
  0x3d   : > { %605 = vmatpush.bf16.msra.mxu1 %v535_v17  ;;  %751 = vmatpush.bf16.msra.mxu3 %v535_v17  ;;  %v531_v55 = vpack.c.bf16 %v333_v44, %v332_v43  ;;  %v522_v56 = vpack.c.bf16 %v315_v46, %v314_v45  ;;  %v330_v57 = vld [vmem:[#allocation8 + $0x80] sm:$0xff]  ;;  %v331_v58 = vld [vmem:[#allocation8 + $0x88] sm:$0xff]  ;;  %v394_v59 = vcvt.s32.f32 %v362_v47  ;;  %v396_v60 = vcvt.s32.f32 %v364_v48  ;;  %v357_v31 = vld [vmem:[%s1468_s30 + $0x18] sm:$0xff] }
  0x3e   : > { %v474_v61 = vcvt.s32.f32 %v442_v49  ;;  %v476_v62 = vcvt.s32.f32 %v444_v50  ;;  %v395_v63 = vcvt.s32.f32 %v363_v51  ;;  %v397_v0 = vcvt.s32.f32 %v365_v52 }
  0x3f   : > { %v475_v1 = vcvt.s32.f32 %v443_v53  ;;  %v477_v2 = vcvt.s32.f32 %v445_v54  ;;  %v530_v3 = vpack.c.bf16 %v331_v58, %v330_v57  ;;  %v426_v4 = vpack.c.bf16 %v396_v60, %v394_v59 }
  0x40   : > { %557 = vmatpush.bf16.msra.mxu0 %v526_v22  ;;  %703 = vmatpush.bf16.msra.mxu2 %v526_v22  ;;  %v506_v5 = vpack.c.bf16 %v476_v62, %v474_v61  ;;  %v427_v6 = vpack.c.bf16 %v397_v0, %v395_v63  ;;  %v366_v8 = vunpack.c.2.s8 %v346_v37  ;;  %v368_v9 = vunpack.c.3.s8 %v346_v37 }
  0x41   : > { %606 = vmatpush.bf16.msra.mxu1 %v534_v23  ;;  %752 = vmatpush.bf16.msra.mxu3 %v534_v23  ;;  %v507_v7 = vpack.c.bf16 %v477_v2, %v475_v1  ;;  %v446_v10 = vunpack.c.2.s8 %v1480_v38  ;;  %v448_v11 = vunpack.c.3.s8 %v1480_v38  ;;  %v367_v12 = vunpack.c.2.s8 %v347_v40 }
  0x42   : > { %v369_v13 = vunpack.c.3.s8 %v347_v40  ;;  %v447_v14 = vunpack.c.2.s8 %v355_v41  ;;  %v449_v15 = vunpack.c.3.s8 %v355_v41  ;;  %v398_v16 = vcvt.s32.f32 %v366_v8  ;;  %v350_v8 = vld [vmem:[%s1461_s11 + $0x20] sm:$0xff] }
  0x43   : > { %v400_v17 = vcvt.s32.f32 %v368_v9  ;;  %v478_v18 = vcvt.s32.f32 %v446_v10  ;;  %v480_v19 = vcvt.s32.f32 %v448_v11  ;;  %v399_v20 = vcvt.s32.f32 %v367_v12  ;;  %v358_v9 = vld [vmem:[%s1468_s30 + $0x20] sm:$0xff]  ;;  %v351_v10 = vld [vmem:[%s1461_s11 + $0x28] sm:$0xff] }
  0x44   : > { %558 = vmatpush.bf16.msra.mxu0 %v525_v28  ;;  %704 = vmatpush.bf16.msra.mxu2 %v525_v28  ;;  %v401_v21 = vcvt.s32.f32 %v369_v13  ;;  %v479_v22 = vcvt.s32.f32 %v447_v14  ;;  %v481_v23 = vcvt.s32.f32 %v449_v15  ;;  %v348_v28 = vld [vmem:[%s1461_s11 + $0x10] sm:$0xff]  ;;  %v373_v37 = vunpack.c.1.s8 %v349_v30  ;;  %v359_v11 = vld [vmem:[%s1468_s30 + $0x28] sm:$0xff] }
  0x45   : > { %607 = vmatpush.bf16.msra.mxu1 %v533_v29  ;;  %753 = vmatpush.bf16.msra.mxu3 %v533_v29  ;;  %v428_v24 = vpack.c.bf16 %v400_v17, %v398_v16  ;;  %v508_v25 = vpack.c.bf16 %v480_v19, %v478_v18  ;;  %v356_v29 = vld [vmem:[%s1468_s30 + $0x10] sm:$0xff]  ;;  %v370_v32 = vunpack.c.0.s8 %v348_v28  ;;  %v372_v33 = vunpack.c.1.s8 %v348_v28 }
  0x46   : > { %v429_v26 = vpack.c.bf16 %v401_v21, %v399_v20  ;;  %v509_v27 = vpack.c.bf16 %v481_v23, %v479_v22  ;;  %v450_v34 = vunpack.c.0.s8 %v356_v29  ;;  %v452_v35 = vunpack.c.1.s8 %v356_v29 }
  0x47   : > { %v451_v38 = vunpack.c.0.s8 %v357_v31  ;;  %v402_v40 = vcvt.s32.f32 %v370_v32  ;;  %v404_v41 = vcvt.s32.f32 %v372_v33  ;;  %v405_v45 = vcvt.s32.f32 %v373_v37 }
  0x48   : > { %559 = vmatpush.bf16.msra.mxu0 %v524_v36  ;;  %705 = vmatpush.bf16.msra.mxu2 %v524_v36  ;;  %v371_v36 = vunpack.c.0.s8 %v349_v30  ;;  %v484_v43 = vcvt.s32.f32 %v452_v35  ;;  %v374_v52 = vunpack.c.2.s8 %v348_v28  ;;  %v376_v53 = vunpack.c.3.s8 %v348_v28 }
  0x49   : > { %608 = vmatpush.bf16.msra.mxu1 %v532_v39  ;;  %754 = vmatpush.bf16.msra.mxu3 %v532_v39  ;;  %v453_v39 = vunpack.c.1.s8 %v357_v31  ;;  %v483_v46 = vcvt.s32.f32 %v451_v38  ;;  %v430_v48 = vpack.c.bf16 %v404_v41, %v402_v40  ;;  %v454_v54 = vunpack.c.2.s8 %v356_v29 }
  0x4a   : > { %v403_v44 = vcvt.s32.f32 %v371_v36  ;;  %v377_v57 = vunpack.c.3.s8 %v349_v30  ;;  %v455_v58 = vunpack.c.2.s8 %v357_v31  ;;  %v457_v59 = vunpack.c.3.s8 %v357_v31 }
  0x4b   : > { %v485_v47 = vcvt.s32.f32 %v453_v39  ;;  %v406_v60 = vcvt.s32.f32 %v374_v52  ;;  %v408_v61 = vcvt.s32.f32 %v376_v53  ;;  %v486_v62 = vcvt.s32.f32 %v454_v54  ;;  %v352_v52 = vld [vmem:[%s1461_s11 + $0x30] sm:$0xff]  ;;  %v353_v54 = vld [vmem:[%s1461_s11 + $0x38] sm:$0xff] }
  0x4c   : > { %560 = vmatpush.bf16.msra.mxu0 %v523_v42  ;;  %706 = vmatpush.bf16.msra.mxu2 %v523_v42  ;;  %v482_v42 = vcvt.s32.f32 %v450_v34  ;;  %v431_v50 = vpack.c.bf16 %v405_v45, %v403_v44  ;;  %v409_v1 = vcvt.s32.f32 %v377_v57  ;;  %v487_v2 = vcvt.s32.f32 %v455_v58  ;;  %v360_v53 = vld [vmem:[%s1468_s30 + $0x30] sm:$0xff] }
  0x4d   : > { %609 = vmatpush.bf16.msra.mxu1 %v531_v55  ;;  %755 = vmatpush.bf16.msra.mxu3 %v531_v55  ;;  %v511_v51 = vpack.c.bf16 %v485_v47, %v483_v46  ;;  %v456_v55 = vunpack.c.3.s8 %v356_v29  ;;  %v378_v12 = vunpack.c.0.s8 %v350_v8  ;;  %v380_v13 = vunpack.c.1.s8 %v350_v8 }
  0x4e   : > { %v510_v49 = vpack.c.bf16 %v484_v43, %v482_v42  ;;  %v458_v14 = vunpack.c.0.s8 %v358_v9  ;;  %v460_v15 = vunpack.c.1.s8 %v358_v9  ;;  %v379_v16 = vunpack.c.0.s8 %v351_v10 }
  0x4f   : > { %v488_v63 = vcvt.s32.f32 %v456_v55  ;;  %v381_v17 = vunpack.c.1.s8 %v351_v10  ;;  %v459_v18 = vunpack.c.0.s8 %v359_v11  ;;  %v461_v19 = vunpack.c.1.s8 %v359_v11  ;;  %v361_v55 = vld [vmem:[%s1468_s30 + $0x38] sm:$0xff] }
  0x50   : > { %561 = vmatpush.bf16.msra.mxu0 %v522_v56  ;;  %707 = vmatpush.bf16.msra.mxu2 %v522_v56  ;;  %v375_v56 = vunpack.c.2.s8 %v349_v30  ;;  %v410_v20 = vcvt.s32.f32 %v378_v12  ;;  %v412_v21 = vcvt.s32.f32 %v380_v13  ;;  %v490_v22 = vcvt.s32.f32 %v458_v14 }
  0x51   : > { %610 = vmatpush.bf16.msra.mxu1 %v530_v3  ;;  %756 = vmatpush.bf16.msra.mxu3 %v530_v3  ;;  %v489_v3 = vcvt.s32.f32 %v457_v59  ;;  %v492_v23 = vcvt.s32.f32 %v460_v15  ;;  %v382_v32 = vunpack.c.2.s8 %v350_v8  ;;  %v384_v33 = vunpack.c.3.s8 %v350_v8 }
  0x52   : > { %v407_v0 = vcvt.s32.f32 %v375_v56  ;;  %v434_v28 = vpack.c.bf16 %v412_v21, %v410_v20  ;;  %v462_v34 = vunpack.c.2.s8 %v358_v9  ;;  %v464_v35 = vunpack.c.3.s8 %v358_v9 }
  0x53   : > { %562 = vmatmul.bf16.vlgmr.msra.gmra.mxu0 %v426_v4  ;;  %708 = vmatmul.bf16.vlgmr.msra.gmra.mxu2 %v506_v5  ;;  %v432_v4 = vpack.c.bf16 %v408_v61, %v406_v60  ;;  %v512_v5 = vpack.c.bf16 %v488_v63, %v486_v62  ;;  %v514_v29 = vpack.c.bf16 %v492_v23, %v490_v22  ;;  %v383_v36 = vunpack.c.2.s8 %v351_v10 }
  0x54   : > { %611 = vmatmul.bf16.vlgmr.msra.gmra.mxu1 %v427_v6  ;;  %757 = vmatmul.bf16.vlgmr.msra.gmra.mxu3 %v507_v7  ;;  %v433_v6 = vpack.c.bf16 %v409_v1, %v407_v0  ;;  %v513_v7 = vpack.c.bf16 %v489_v3, %v487_v2  ;;  %v385_v37 = vunpack.c.3.s8 %v351_v10  ;;  %v463_v38 = vunpack.c.2.s8 %v359_v11 }
  0x55   : > { %v465_v39 = vunpack.c.3.s8 %v359_v11  ;;  %v414_v40 = vcvt.s32.f32 %v382_v32  ;;  %v416_v41 = vcvt.s32.f32 %v384_v33  ;;  %v494_v42 = vcvt.s32.f32 %v462_v34 }
  0x56   : > { %v496_v43 = vcvt.s32.f32 %v464_v35  ;;  %v415_v44 = vcvt.s32.f32 %v383_v36  ;;  %v417_v45 = vcvt.s32.f32 %v385_v37  ;;  %v495_v46 = vcvt.s32.f32 %v463_v38 }
  0x57   : > { %v497_v47 = vcvt.s32.f32 %v465_v39  ;;  %v386_v56 = vunpack.c.0.s8 %v352_v52  ;;  %v388_v57 = vunpack.c.1.s8 %v352_v52  ;;  %v466_v58 = vunpack.c.0.s8 %v360_v53 }
  0x58   : > { %v468_v59 = vunpack.c.1.s8 %v360_v53  ;;  %v387_v60 = vunpack.c.0.s8 %v353_v54  ;;  %v389_v61 = vunpack.c.1.s8 %v353_v54  ;;  %v467_v62 = vunpack.c.0.s8 %v361_v55 }
  0x59   : > { %v469_v63 = vunpack.c.1.s8 %v361_v55  ;;  %v418_v0 = vcvt.s32.f32 %v386_v56  ;;  %v420_v1 = vcvt.s32.f32 %v388_v57  ;;  %v498_v2 = vcvt.s32.f32 %v466_v58 }
  0x5a   : > { %v500_v3 = vcvt.s32.f32 %v468_v59  ;;  %v390_v12 = vunpack.c.2.s8 %v352_v52  ;;  %v392_v13 = vunpack.c.3.s8 %v352_v52  ;;  %v470_v14 = vunpack.c.2.s8 %v360_v53 }
  0x5b   : > { %v438_v8 = vpack.c.bf16 %v420_v1, %v418_v0  ;;  %v472_v15 = vunpack.c.3.s8 %v360_v53 }
  0x5c   : > { %v518_v9 = vpack.c.bf16 %v500_v3, %v498_v2  ;;  %v422_v20 = vcvt.s32.f32 %v390_v12  ;;  %v424_v21 = vcvt.s32.f32 %v392_v13  ;;  %v502_v22 = vcvt.s32.f32 %v470_v14 }
  0x5d   : > { %v504_v23 = vcvt.s32.f32 %v472_v15 }
  0x63   : > { %567 = vmatmul.bf16.gmra.mxu0 %v428_v24  ;;  %713 = vmatmul.bf16.gmra.mxu2 %v508_v25  ;;  %v411_v24 = vcvt.s32.f32 %v379_v16  ;;  %v413_v25 = vcvt.s32.f32 %v381_v17  ;;  %v391_v16 = vunpack.c.2.s8 %v353_v54  ;;  %v393_v17 = vunpack.c.3.s8 %v353_v54 }
  0x64   : > { %616 = vmatmul.bf16.gmra.mxu1 %v429_v26  ;;  %762 = vmatmul.bf16.gmra.mxu3 %v509_v27  ;;  %v491_v26 = vcvt.s32.f32 %v459_v18  ;;  %v493_v27 = vcvt.s32.f32 %v461_v19  ;;  %v471_v18 = vunpack.c.2.s8 %v361_v55  ;;  %v473_v19 = vunpack.c.3.s8 %v361_v55 }
  0x65   : > { %v435_v30 = vpack.c.bf16 %v413_v25, %v411_v24  ;;  %v423_v24 = vcvt.s32.f32 %v391_v16  ;;  %v425_v25 = vcvt.s32.f32 %v393_v17 }
  0x66   : > { %v515_v31 = vpack.c.bf16 %v493_v27, %v491_v26  ;;  %v503_v26 = vcvt.s32.f32 %v471_v18  ;;  %v505_v27 = vcvt.s32.f32 %v473_v19 }
  0x73   : > { %572 = vmatmul.bf16.gmra.mxu0 %v430_v48  ;;  %718 = vmatmul.bf16.gmra.mxu2 %v510_v49  ;;  %v436_v48 = vpack.c.bf16 %v416_v41, %v414_v40  ;;  %v516_v49 = vpack.c.bf16 %v496_v43, %v494_v42 }
  0x74   : > { %621 = vmatmul.bf16.gmra.mxu1 %v431_v50  ;;  %767 = vmatmul.bf16.gmra.mxu3 %v511_v51  ;;  %v437_v50 = vpack.c.bf16 %v417_v45, %v415_v44  ;;  %v517_v51 = vpack.c.bf16 %v497_v47, %v495_v46 }
  0x83   : > { %577 = vmatmul.bf16.gmra.mxu0 %v432_v4  ;;  %723 = vmatmul.bf16.gmra.mxu2 %v512_v5  ;;  %v419_v4 = vcvt.s32.f32 %v387_v60  ;;  %v421_v5 = vcvt.s32.f32 %v389_v61 }
  0x84   : > { %626 = vmatmul.bf16.gmra.mxu1 %v433_v6  ;;  %772 = vmatmul.bf16.gmra.mxu3 %v513_v7  ;;  %v499_v6 = vcvt.s32.f32 %v467_v62  ;;  %v501_v7 = vcvt.s32.f32 %v469_v63 }
  0x85   : > { %v439_v10 = vpack.c.bf16 %v421_v5, %v419_v4 }
  0x86   : > { %v519_v11 = vpack.c.bf16 %v501_v7, %v499_v6 }
  0x93   : > { %582 = vmatmul.bf16.gmra.mxu0 %v434_v28  ;;  %728 = vmatmul.bf16.gmra.mxu2 %v514_v29  ;;  %v440_v28 = vpack.c.bf16 %v424_v21, %v422_v20  ;;  %v520_v29 = vpack.c.bf16 %v504_v23, %v502_v22 }
  0x94   : > { %631 = vmatmul.bf16.gmra.mxu1 %v435_v30  ;;  %777 = vmatmul.bf16.gmra.mxu3 %v515_v31  ;;  %v441_v30 = vpack.c.bf16 %v425_v25, %v423_v24  ;;  %v521_v31 = vpack.c.bf16 %v505_v27, %v503_v26 }
  0xa3   : > { %587 = vmatmul.bf16.gmra.mxu0 %v436_v48  ;;  %733 = vmatmul.bf16.gmra.mxu2 %v516_v49 }
  0xa4   : > { %636 = vmatmul.bf16.gmra.mxu1 %v437_v50  ;;  %782 = vmatmul.bf16.gmra.mxu3 %v517_v51 }
  0xb3   : > { %592 = vmatmul.bf16.gmra.mxu0 %v438_v8  ;;  %738 = vmatmul.bf16.gmra.mxu2 %v518_v9 }
  0xb4   : > { %641 = vmatmul.bf16.gmra.mxu1 %v439_v10  ;;  %787 = vmatmul.bf16.gmra.mxu3 %v519_v11 }
  0xc3   : > { %597 = vmatmul.bf16.gmra.mxu0 %v440_v28  ;;  %743 = vmatmul.bf16.gmra.mxu2 %v520_v29 }
  0xc4   : > { %646 = vmatmul.bf16.gmra.mxu1 %v441_v30  ;;  %792 = vmatmul.bf16.gmra.mxu3 %v521_v31 }
  0xd0   : > { %v563_v32 = vpop.f32.mrf.mxu0 }
  0xd1   : > { %v612_v33 = vpop.f32.mrf.mxu1 }
  0xd2   : > { %v613_v34 = vadd.f32 %v612_v33, %v563_v32 }
  0xd4   : > { %865 = vst [vmem:[%s1501_s20] sm:$0xff] %v613_v34 }
  0xd6   : > { %v709_v35 = vpop.f32.mrf.mxu2 }
  0xd7   : > { %v758_v36 = vpop.f32.mrf.mxu3 }
  0xd8   : > { %v759_v37 = vadd.f32 %v758_v36, %v709_v35  ;;  %v565_v38 = vpop.f32.mrf.mxu0 }
  0xd9   : > { %v614_v39 = vpop.f32.mrf.mxu1 }
  0xda   : > { %866 = vst [vmem:[%s1501_s20 + $0x8] sm:$0xff] %v759_v37  ;;  %v615_v40 = vadd.f32 %v614_v39, %v565_v38 }
  0xdc   : > { %867 = vst [vmem:[%s1501_s20 + $0x10] sm:$0xff] %v615_v40 }
  0xde   : > { %v711_v41 = vpop.f32.mrf.mxu2 }
  0xdf   : > { %v760_v42 = vpop.f32.mrf.mxu3 }
  0xe0   : > { %v761_v43 = vadd.f32 %v760_v42, %v711_v41  ;;  %v568_v44 = vpop.f32.mrf.mxu0 }
  0xe1   : > { %v617_v45 = vpop.f32.mrf.mxu1 }
  0xe2   : > { %868 = vst [vmem:[%s1501_s20 + $0x18] sm:$0xff] %v761_v43  ;;  %v618_v46 = vadd.f32 %v617_v45, %v568_v44 }
  0xe4   : > { %869 = vst [vmem:[%s1501_s20 + $0x20] sm:$0xff] %v618_v46 }
  0xe6   : > { %v714_v47 = vpop.f32.mrf.mxu2 }
  0xe7   : > { %v763_v48 = vpop.f32.mrf.mxu3 }
  0xe8   : > { %v764_v49 = vadd.f32 %v763_v48, %v714_v47  ;;  %v570_v50 = vpop.f32.mrf.mxu0 }
  0xe9   : > { %v619_v51 = vpop.f32.mrf.mxu1 }
  0xea   : > { %870 = vst [vmem:[%s1501_s20 + $0x28] sm:$0xff] %v764_v49  ;;  %v620_v52 = vadd.f32 %v619_v51, %v570_v50 }
  0xec   : > { %871 = vst [vmem:[%s1501_s20 + $0x30] sm:$0xff] %v620_v52 }
  0xee   : > { %v716_v53 = vpop.f32.mrf.mxu2 }
  0xef   : > { %v765_v54 = vpop.f32.mrf.mxu3 }
  0xf0   : > { %v766_v55 = vadd.f32 %v765_v54, %v716_v53  ;;  %v573_v56 = vpop.f32.mrf.mxu0 }
  0xf1   : > { %v622_v57 = vpop.f32.mrf.mxu1 }
  0xf2   : > { %872 = vst [vmem:[%s1501_s20 + $0x38] sm:$0xff] %v766_v55  ;;  %v623_v58 = vadd.f32 %v622_v57, %v573_v56 }
  0xf4   : > { %873 = vst [vmem:[%s1501_s20 + $0x40] sm:$0xff] %v623_v58 }
  0xf6   : > { %v719_v59 = vpop.f32.mrf.mxu2 }
  0xf7   : > { %v768_v60 = vpop.f32.mrf.mxu3 }
  0xf8   : > { %v769_v61 = vadd.f32 %v768_v60, %v719_v59  ;;  %v575_v62 = vpop.f32.mrf.mxu0 }
  0xf9   : > { %v624_v63 = vpop.f32.mrf.mxu1 }
  0xfa   : > { %874 = vst [vmem:[%s1501_s20 + $0x48] sm:$0xff] %v769_v61  ;;  %v625_v0 = vadd.f32 %v624_v63, %v575_v62 }
  0xfc   : > { %875 = vst [vmem:[%s1501_s20 + $0x50] sm:$0xff] %v625_v0 }
  0xfe   : > { %v721_v1 = vpop.f32.mrf.mxu2 }
  0xff   : > { %v770_v2 = vpop.f32.mrf.mxu3 }
 0x100   : > { %v771_v3 = vadd.f32 %v770_v2, %v721_v1  ;;  %v578_v4 = vpop.f32.mrf.mxu0 }
 0x101   : > { %v627_v5 = vpop.f32.mrf.mxu1 }
 0x102   : > { %876 = vst [vmem:[%s1501_s20 + $0x58] sm:$0xff] %v771_v3  ;;  %v628_v6 = vadd.f32 %v627_v5, %v578_v4 }
 0x104   : > { %877 = vst [vmem:[%s1501_s20 + $0x60] sm:$0xff] %v628_v6 }
 0x106   : > { %v724_v7 = vpop.f32.mrf.mxu2 }
 0x107   : > { %v773_v8 = vpop.f32.mrf.mxu3 }
 0x108   : > { %v774_v9 = vadd.f32 %v773_v8, %v724_v7  ;;  %v580_v10 = vpop.f32.mrf.mxu0 }
 0x109   : > { %v629_v11 = vpop.f32.mrf.mxu1 }
 0x10a   : > { %878 = vst [vmem:[%s1501_s20 + $0x68] sm:$0xff] %v774_v9  ;;  %v630_v12 = vadd.f32 %v629_v11, %v580_v10 }
 0x10c   : > { %879 = vst [vmem:[%s1501_s20 + $0x70] sm:$0xff] %v630_v12 }
 0x10e   : > { %v726_v13 = vpop.f32.mrf.mxu2 }
 0x10f   : > { %v775_v14 = vpop.f32.mrf.mxu3 }
 0x110   : > { %v776_v15 = vadd.f32 %v775_v14, %v726_v13  ;;  %v583_v16 = vpop.f32.mrf.mxu0 }
 0x111   : > { %v632_v17 = vpop.f32.mrf.mxu1 }
 0x112   : > { %880 = vst [vmem:[%s1501_s20 + $0x78] sm:$0xff] %v776_v15  ;;  %v633_v18 = vadd.f32 %v632_v17, %v583_v16 }
 0x114   : > { %881 = vst [vmem:[%s1501_s20 + $0x80] sm:$0xff] %v633_v18 }
 0x116   : > { %v729_v19 = vpop.f32.mrf.mxu2 }
 0x117   : > { %v778_v20 = vpop.f32.mrf.mxu3 }
 0x118   : > { %v779_v21 = vadd.f32 %v778_v20, %v729_v19  ;;  %v585_v22 = vpop.f32.mrf.mxu0 }
 0x119   : > { %v634_v23 = vpop.f32.mrf.mxu1 }
 0x11a   : > { %882 = vst [vmem:[%s1501_s20 + $0x88] sm:$0xff] %v779_v21  ;;  %v635_v24 = vadd.f32 %v634_v23, %v585_v22 }
 0x11c   : > { %883 = vst [vmem:[%s1501_s20 + $0x90] sm:$0xff] %v635_v24 }
 0x11e   : > { %v731_v25 = vpop.f32.mrf.mxu2 }
 0x11f   : > { %v780_v26 = vpop.f32.mrf.mxu3 }
 0x120   : > { %v781_v27 = vadd.f32 %v780_v26, %v731_v25  ;;  %v588_v28 = vpop.f32.mrf.mxu0 }
 0x121   : > { %v637_v29 = vpop.f32.mrf.mxu1 }
 0x122   : > { %884 = vst [vmem:[%s1501_s20 + $0x98] sm:$0xff] %v781_v27  ;;  %v638_v30 = vadd.f32 %v637_v29, %v588_v28 }
 0x124   : > { %885 = vst [vmem:[%s1501_s20 + $0xa0] sm:$0xff] %v638_v30 }
 0x126   : > { %v734_v31 = vpop.f32.mrf.mxu2 }
 0x127   : > { %v783_v32 = vpop.f32.mrf.mxu3 }
 0x128   : > { %v784_v33 = vadd.f32 %v783_v32, %v734_v31  ;;  %v590_v34 = vpop.f32.mrf.mxu0 }
 0x129   : > { %v639_v35 = vpop.f32.mrf.mxu1 }
 0x12a   : > { %886 = vst [vmem:[%s1501_s20 + $0xa8] sm:$0xff] %v784_v33  ;;  %v640_v36 = vadd.f32 %v639_v35, %v590_v34 }
 0x12c   : > { %887 = vst [vmem:[%s1501_s20 + $0xb0] sm:$0xff] %v640_v36 }
 0x12e   : > { %v736_v37 = vpop.f32.mrf.mxu2 }
 0x12f   : > { %v785_v38 = vpop.f32.mrf.mxu3 }
 0x130   : > { %v786_v39 = vadd.f32 %v785_v38, %v736_v37  ;;  %v593_v40 = vpop.f32.mrf.mxu0 }
 0x131   : > { %v642_v41 = vpop.f32.mrf.mxu1 }
 0x132   : > { %888 = vst [vmem:[%s1501_s20 + $0xb8] sm:$0xff] %v786_v39  ;;  %v643_v42 = vadd.f32 %v642_v41, %v593_v40 }
 0x134   : > { %889 = vst [vmem:[%s1501_s20 + $0xc0] sm:$0xff] %v643_v42 }
 0x136   : > { %v739_v43 = vpop.f32.mrf.mxu2 }
 0x137   : > { %v788_v44 = vpop.f32.mrf.mxu3 }
 0x138   : > { %v789_v45 = vadd.f32 %v788_v44, %v739_v43  ;;  %v595_v46 = vpop.f32.mrf.mxu0 }
 0x139   : > { %v644_v47 = vpop.f32.mrf.mxu1 }
 0x13a   : > { %890 = vst [vmem:[%s1501_s20 + $0xc8] sm:$0xff] %v789_v45  ;;  %v645_v48 = vadd.f32 %v644_v47, %v595_v46 }
 0x13c   : > { %891 = vst [vmem:[%s1501_s20 + $0xd0] sm:$0xff] %v645_v48 }
 0x13e   : > { %v741_v49 = vpop.f32.mrf.mxu2 }
 0x13f   : > { %v790_v50 = vpop.f32.mrf.mxu3 }
 0x140   : > { %v791_v51 = vadd.f32 %v790_v50, %v741_v49  ;;  %v598_v52 = vpop.f32.mrf.mxu0 }
 0x141   : > { %v647_v53 = vpop.f32.mrf.mxu1 }
 0x142   : > { %892 = vst [vmem:[%s1501_s20 + $0xd8] sm:$0xff] %v791_v51  ;;  %v648_v54 = vadd.f32 %v647_v53, %v598_v52 }
 0x144   : > { %893 = vst [vmem:[%s1501_s20 + $0xe0] sm:$0xff] %v648_v54 }
 0x146   : > { %v744_v55 = vpop.f32.mrf.mxu2 }
 0x147   : > { %v793_v56 = vpop.f32.mrf.mxu3 }
 0x148   : > { %v794_v57 = vadd.f32 %v793_v56, %v744_v55  ;;  %v600_v58 = vpop.f32.mrf.mxu0 }
 0x149   : > { %v649_v59 = vpop.f32.mrf.mxu1 }
 0x14a   : > { %894 = vst [vmem:[%s1501_s20 + $0xe8] sm:$0xff] %v794_v57  ;;  %v650_v60 = vadd.f32 %v649_v59, %v600_v58 }
 0x14c   : > { %895 = vst [vmem:[%s1501_s20 + $0xf0] sm:$0xff] %v650_v60 }
 0x14e   : > { %v746_v61 = vpop.f32.mrf.mxu2 }
 0x14f   : > { %v795_v62 = vpop.f32.mrf.mxu3 }
 0x150   : > { %v796_v63 = vadd.f32 %v795_v62, %v746_v61 }
 0x152   : > { %896 = vst [vmem:[%s1501_s20 + $0xf8] sm:$0xff] %v796_v63 }
 0x153   : > { %1266 = shalt.err (!%p1263_p0)
}
 0x154   : > { %s1336_s5 = smov 256   ;;  %s1337_s2 = smov 16  }
 0x155   : > { %1073 = dma.vmem_to_hbm [thread:$0]  (%p1433_p5), %s912_s27, 4096, %s914_s28, %s898_s15, %s1336_s5, %s1336_s5, %s1337_s2  }
 0x156 PF: > { %s928_s11 = sand.u32 1, %s1309_s12   ;;  %p1087_p3 = pnand %p1039_p11, %p1403_p6 }
 0x157   : > { %s929_s16 = scalar_lea.sflag [#allocation5], %s928_s11 }
 0x158   : > { %p1088_p7 = pneg %p1087_p3 }
 0x15a   : > { %1304 = dma.done.wait (%p1088_p7), %s929_s16, 4096  }
 0x15b   : > { %1306 = vsyncadd (%p1088_p7), %s929_s16, 4294963200  ;;  %s22_s17 = sadd.s32 1, %s1329_s17   ;;  %s1590_s25 = sld [smem:[#allocation16_spill]] }
 0x15c   : > { %p19_p9 = scmp.ge.s32.totalorder %s22_s17, 4   ;;  %s1591_s15 = sld [smem:[#allocation14_spill]] }
 0x15d   : > { %s1592_s16 = sld [smem:[#allocation15_spill]]  ;;  %s1593_s12 = smov %s1313_s13 }
 0x15e   : > { %s1594_s13 = smov %s1317_s14  ;;  %21 = sbr.rel (!%p19_p9) target bundleno = 10 (0xa), region = 103 }
 0x161   : > { %s1595_s14 = smov %s1590_s25 }
 0x163   :  { %935 = vsyncpa [#allocation4], 1 }
 0x164   :  { %937 = vsyncpa [#allocation4 + $0x1], 1 }
 0x165   :  { %938 = vsyncpa [#allocation7], 1 }
 0x166   :  { %940 = vsyncpa [#allocation7 + $0x1], 1 }
 0x167   :  { %941 = vsyncpa [#allocation5], 1 }
 0x168   :  { %943 = vsyncpa [#allocation5 + $0x1], 1 }

</bundles_post_ra>
